<compile_context>
chip_gen: v7x
topology: tpu7x:2x2x1
jax: 0.10.0
libtpu: 0.0.40
codegen_flags: <defaults>
</compile_context>

<pallas_src>
import jax
import jax.numpy as jnp
from jax.experimental import pallas as pl
from jax.experimental.pallas import tpu as pltpu


def _round_up(x, m):
    return ((x + m - 1) // m) * m


def _make_critic_kernel(n_chunks, chunk):
    def kernel(x_ref, w1_ref, b1_ref, w2_ref, b2_ref, o_ref):
        # x_ref : (TM, E)     activation rows for this tile (f32 or bf16)
        # w1_ref: (H, E)      first Linear weight (PyTorch [out, in]), resident
        # b1_ref: (H, 1)      first bias as a column, resident
        # w2_ref: (H, 1)      second Linear weight as a column, resident
        # b2_ref: (1, 1)      second bias, SMEM scalar
        # o_ref : (1, 1, TM)  lane-dense critic values for this row tile
        w1 = w1_ref[...]
        b1 = b1_ref[...]
        w2 = w2_ref[...]
        b2 = b2_ref[0, 0]
        # Static 128-aligned sub-chunks of TM keep the (H, chunk) f32 hidden
        # activation near registers (no VMEM round-trip at large TM); stores are
        # unmasked full-lane vst at static offsets.
        for c in range(n_chunks):
            off = c * chunk
            x_c = x_ref[off:off + chunk, :]                       # (chunk, E)
            # h[k, m] = sum_e W1[k, e] * x[m, e]  — contraction on E carried by
            # dot_general (no traced transpose of the x tile), f32 accumulation.
            h = jax.lax.dot_general(
                w1, x_c,
                dimension_numbers=(((1,), (1,)), ((), ())),
                preferred_element_type=jnp.float32)               # (H, chunk)
            h = jnp.maximum(h + b1, 0.0)                          # VPU
            # Width-1 projection: VPU mul + XLU sublane reduce -> lane-dense (1, chunk).
            v = jnp.sum(h * w2, axis=0, keepdims=True) + b2
            o_ref[:, :, off:off + chunk] = v.reshape(1, 1, chunk).astype(o_ref.dtype)
    return kernel


def agent_attention_critic_pallas(agent_embed, params, mode="None", tile_m=None):
    """agent_embed: [B, N, E] (f32 or bf16).  params in PyTorch nn.Linear layout."""
    w1, b1, w2, b2 = params["w1"], params["b1"], params["w2"], params["b2"]
    B, N, E = agent_embed.shape
    H = w1.shape[0]
    M = B * N

    x2d = agent_embed.reshape(M, E)
    itemsize = jnp.dtype(x2d.dtype).itemsize
    lane_row_bytes = _round_up(E, 128) * itemsize          # VMEM lane-pads E to 128

    # --- row-tile selection (this op is HBM-bound) ---------------------------
    if tile_m is None:
        tile_m = (2 << 20) // lane_row_bytes               # ~2 MiB of lane-padded x / buffer
    tile_m = max(128, _round_up(min(int(tile_m), 8192), 128))
    if M > 2 * 128:
        # Keep >= 2 grid steps so both v7x TensorCores get work and DMA overlaps compute.
        tile_m = min(tile_m, _round_up(pl.cdiv(M, 2), 128))
    tile_m = min(tile_m, _round_up(M, 128))
    grid_m = pl.cdiv(M, tile_m)                            # no wrapper pad; partial last
                                                           # block is sliced off below

    # --- inner chunk so (H, chunk) f32 hidden stays near the vreg file -------
    max_chunk = max(128, ((128 << 10) // max(H * 4, 1)) // 128 * 128)
    chunk = 128
    for c in (1024, 512, 256, 128):
        if c <= max_chunk and tile_m % c == 0:
            chunk = c
            break
    n_chunks = tile_m // chunk

    # --- operands -------------------------------------------------------------
    w1m = w1.astype(x2d.dtype)                             # tiny + resident; match MXU dtype
    b1c = b1.reshape(H, 1).astype(jnp.float32)
    w2c = w2.reshape(H, 1).astype(jnp.float32)
    b2s = b2.reshape(1, 1).astype(jnp.float32)

    # --- VMEM budget (double-buffered x dominates) ----------------------------
    vmem_est = (2 * tile_m * lane_row_bytes                # x double buffer (lane padded)
                + 2 * tile_m * 4                           # output double buffer
                + 2 * H * lane_row_bytes                   # W1 resident
                + 8 * H * 4 + 4096)
    vmem_limit = None
    if vmem_est > 12 * (1 << 20):                          # v5e scoped default is 16 MiB
        vmem_limit = min(int(vmem_est * 2), 48 << 20)      # stay under v7x's 64 MiB physical

    cost = pl.CostEstimate(
        flops=2 * M * E * H + 4 * M * H,
        transcendentals=0,
        bytes_accessed=M * E * itemsize + M * 4 + H * E * itemsize + (2 * H + 1) * 4,
    )

    rows = pl.pallas_call(
        _make_critic_kernel(n_chunks, chunk),
        out_shape=jax.ShapeDtypeStruct((grid_m, 1, tile_m), jnp.float32),
        grid=(grid_m,),
        in_specs=[
            pl.BlockSpec((tile_m, E), lambda i: (i, 0)),           # x row tile
            pl.BlockSpec((H, E), lambda i: (0, 0)),                # W1 (resident)
            pl.BlockSpec((H, 1), lambda i: (0, 0)),                # b1 (resident)
            pl.BlockSpec((H, 1), lambda i: (0, 0)),                # w2 (resident)
            pl.BlockSpec(memory_space=pltpu.MemorySpace.SMEM),     # b2 scalar
        ],
        out_specs=pl.BlockSpec((1, 1, tile_m), lambda i: (i, 0, 0)),
        compiler_params=pltpu.CompilerParams(
            dimension_semantics=("parallel",),
            vmem_limit_bytes=vmem_limit,
        ),
        cost_estimate=cost,
    )(x2d, w1m, b1c, w2c, b2s)

    v = rows.reshape(grid_m * tile_m)[:M].reshape(B, N, 1)

    # mode reductions over dim=1 (agents) — matches torch semantics
    # (torch.max(dim=1)[0] == values only).
    if mode == "mean":
        v = v.mean(axis=1)
    elif mode == "max":
        v = v.max(axis=1)
    elif mode == "sum":
        v = v.sum(axis=1)
    return v


def init_params(key, embed_dim, hidden_size):
    # PyTorch nn.Linear layout: w1 [H, E], b1 [H], w2 [1, H], b2 [1].
    k1, k2, k3, k4 = jax.random.split(key, 4)
    w1 = jax.random.normal(k1, (hidden_size, embed_dim), jnp.float32) * 0.1
    b1 = jax.random.normal(k2, (hidden_size,), jnp.float32) * 0.1
    w2 = jax.random.normal(k3, (1, hidden_size), jnp.float32) * 0.1
    b2 = jax.random.normal(k4, (1,), jnp.float32) * 0.1
    return {"w1": w1, "b1": b1, "w2": w2, "b2": b2}


def reference_forward(agent_embed, params, mode="None"):
    h = jnp.maximum(agent_embed @ params["w1"].T + params["b1"], 0.0)
    v = h @ params["w2"].T + params["b2"]
    if mode == "mean":
        v = v.mean(axis=1)
    elif mode == "max":
        v = v.max(axis=1)
    elif mode == "sum":
        v = v.sum(axis=1)
    return v


if __name__ == "__main__":
    keys = jax.random.split(jax.random.PRNGKey(0), 4)
    ok = True

    # Case 1: module-spec-sized shapes (B=2, N=8 agents, E=32, H=32), f32.
    x_small = jax.random.normal(keys[0], (2, 8, 32), jnp.float32)   # [B, N, E]
    p_small = init_params(keys[1], 32, 32)
    for mode in ("None", "mean", "max", "sum"):
        out = jax.block_until_ready(
            agent_attention_critic_pallas(x_small, p_small, mode=mode))
        ref = reference_forward(x_small, p_small, mode=mode)
        if out.shape != ref.shape or not jnp.allclose(out, ref, atol=1e-4, rtol=1e-4):
            ok = False
            print(f"MISMATCH small f32 mode={mode} "
                  f"max_err={float(jnp.max(jnp.abs(out - ref)))}")

    # Case 2: ragged M=400 -> 2-step grid with an UNPADDED partial last block.
    x_big = jax.random.normal(keys[2], (4, 100, 32), jnp.float32)
    p_big = init_params(keys[3], 32, 64)                            # E=32, H=64
    for mode in ("None", "mean", "max", "sum"):
        out = jax.block_until_ready(
            agent_attention_critic_pallas(x_big, p_big, mode=mode))
        ref = reference_forward(x_big, p_big, mode=mode)
        if out.shape != ref.shape or not jnp.allclose(out, ref, atol=1e-4, rtol=1e-4):
            ok = False
            print(f"MISMATCH big f32 mode={mode} "
                  f"max_err={float(jnp.max(jnp.abs(out - ref)))}")

    # Case 3: bf16 activations supplied directly by the producer (no wrapper cast of f32 x).
    x_bf16 = x_big.astype(jnp.bfloat16)
    out_bf16 = jax.block_until_ready(
        agent_attention_critic_pallas(x_bf16, p_big, mode="None"))
    ref_bf16 = reference_forward(x_big, p_big, mode="None")
    if out_bf16.shape != ref_bf16.shape or not jnp.allclose(
            out_bf16, ref_bf16, atol=3e-2, rtol=3e-2):
        ok = False
        print(f"MISMATCH bf16 max_err={float(jnp.max(jnp.abs(out_bf16 - ref_bf16)))}")

    if ok:
        print("KERNEL_OK")
</pallas_src>

<mosaic_0001>
module attributes {stable_mosaic.version = 11 : i64} {
  func.func @kernel(%arg0: i32, %arg1: memref<128x32xf32, #tpu.memory_space<vmem>>, %arg2: memref<32x32xf32, #tpu.memory_space<vmem>>, %arg3: memref<32x1xf32, #tpu.memory_space<vmem>>, %arg4: memref<32x1xf32, #tpu.memory_space<vmem>>, %arg5: memref<1x1xf32, #tpu.memory_space<smem>>, %arg6: memref<1x1x128xf32, #tpu.memory_space<vmem>>) attributes {dimension_semantics = [#tpu.dimension_semantics<parallel>], iteration_bounds = array<i64: 1>, scalar_prefetch = 0 : i64, scratch_operands = 0 : i64, tpu.core_type = #tpu.core_type<tc>, window_params = [{transform_indices = @transform_0, window_bounds = array<i64: 128, 32>}, {pipeline_mode = #tpu.pipeline_mode<synchronous>, transform_indices = @transform_1, window_bounds = array<i64: 32, 32>}, {pipeline_mode = #tpu.pipeline_mode<synchronous>, transform_indices = @transform_2, window_bounds = array<i64: 32, 1>}, {pipeline_mode = #tpu.pipeline_mode<synchronous>, transform_indices = @transform_3, window_bounds = array<i64: 32, 1>}, {transform_indices = @transform_4, window_bounds = array<i64: 1, 1>}, {transform_indices = @transform_5, window_bounds = array<i64: 1, 1, 128>}]} {
    %c0 = arith.constant 0 : index
    %c0_0 = arith.constant 0 : index
    %0 = vector.load %arg2[%c0, %c0_0] : memref<32x32xf32, #tpu.memory_space<vmem>>, vector<32x32xf32>
    %c0_1 = arith.constant 0 : index
    %c0_2 = arith.constant 0 : index
    %1 = vector.load %arg3[%c0_1, %c0_2] : memref<32x1xf32, #tpu.memory_space<vmem>>, vector<32x1xf32>
    %c0_3 = arith.constant 0 : index
    %c0_4 = arith.constant 0 : index
    %2 = vector.load %arg4[%c0_3, %c0_4] : memref<32x1xf32, #tpu.memory_space<vmem>>, vector<32x1xf32>
    %c0_5 = arith.constant 0 : index
    %c0_6 = arith.constant 0 : index
    %3 = memref.load %arg5[%c0_5, %c0_6] : memref<1x1xf32, #tpu.memory_space<smem>>
    %c0_7 = arith.constant 0 : index
    %c0_8 = arith.constant 0 : index
    %4 = vector.load %arg1[%c0_7, %c0_8] : memref<128x32xf32, #tpu.memory_space<vmem>>, vector<128x32xf32>
    %cst = arith.constant dense<0.000000e+00> : vector<32x128xf32>
    %5 = tpu.matmul %0, %4, %cst {dimension_numbers = #tpu.dot_dimension_numbers<[1], [1], [0], [0], [0, 0, 1, 0], [], []>} : vector<32x32xf32>, vector<128x32xf32>, vector<32x128xf32> -> vector<32x128xf32>
    %6 = vector.broadcast %1 : vector<32x1xf32> to vector<32x128xf32>
    %7 = arith.addf %5, %6 : vector<32x128xf32>
    %cst_9 = arith.constant 0.000000e+00 : f32
    %8 = vector.broadcast %cst_9 : f32 to vector<32x128xf32>
    %9 = arith.maximumf %7, %8 : vector<32x128xf32>
    %10 = vector.broadcast %2 : vector<32x1xf32> to vector<32x128xf32>
    %11 = arith.mulf %9, %10 : vector<32x128xf32>
    %cst_10 = arith.constant dense<0.000000e+00> : vector<128xf32>
    %12 = vector.multi_reduction <add>, %11, %cst_10 [0] : vector<32x128xf32> to vector<128xf32>
    %13 = vector.shape_cast %12 : vector<128xf32> to vector<1x128xf32>
    %14 = vector.broadcast %3 : f32 to vector<1x128xf32>
    %15 = arith.addf %13, %14 : vector<1x128xf32>
    %16 = vector.shape_cast %15 : vector<1x128xf32> to vector<1x1x128xf32>
    %c0_11 = arith.constant 0 : index
    %c0_12 = arith.constant 0 : index
    %c0_13 = arith.constant 0 : index
    %17 = vector.load %arg6[%c0_11, %c0_12, %c0_13] : memref<1x1x128xf32, #tpu.memory_space<vmem>>, vector<1x1x128xf32>
    tpu.vector_store %arg6[%c0_11, %c0_12, %c0_13], %16 {strides = array<i32>} : memref<1x1x128xf32, #tpu.memory_space<vmem>>, vector<1x1x128xf32>,
    return
  }
  func.func @transform_0(%arg0: i32) -> (i32, i32) {
    %c0_i32 = arith.constant 0 : i32
    %c0_i32_0 = arith.constant 0 : i32
    return %arg0, %c0_i32 : i32, i32
  }
  func.func @transform_1(%arg0: i32) -> (i32, i32) {
    %c0_i32 = arith.constant 0 : i32
    %c0_i32_0 = arith.constant 0 : i32
    %c0_i32_1 = arith.constant 0 : i32
    return %c0_i32, %c0_i32_0 : i32, i32
  }
  func.func @transform_2(%arg0: i32) -> (i32, i32) {
    %c0_i32 = arith.constant 0 : i32
    %c0_i32_0 = arith.constant 0 : i32
    %c0_i32_1 = arith.constant 0 : i32
    return %c0_i32, %c0_i32_0 : i32, i32
  }
  func.func @transform_3(%arg0: i32) -> (i32, i32) {
    %c0_i32 = arith.constant 0 : i32
    %c0_i32_0 = arith.constant 0 : i32
    %c0_i32_1 = arith.constant 0 : i32
    return %c0_i32, %c0_i32_0 : i32, i32
  }
  func.func @transform_4(%arg0: i32) -> (i32, i32) {
    %c0_i32 = arith.constant 0 : i32
    %c0_i32_0 = arith.constant 0 : i32
    %c0_i32_1 = arith.constant 0 : i32
    return %c0_i32, %c0_i32_0 : i32, i32
  }
  func.func @transform_5(%arg0: i32) -> (i32, i32, i32) {
    %c0_i32 = arith.constant 0 : i32
    %c0_i32_0 = arith.constant 0 : i32
    %c0_i32_1 = arith.constant 0 : i32
    return %arg0, %c0_i32, %c0_i32_0 : i32, i32, i32
  }
}

</mosaic_0001>

<bundles_post_ra>
// kernel: tpu_custom_call.1
= control target key start
LH: loop header
LB: loop body
LE: loop exit
PB: predicated region body
PF: predicated region fallthrough
CT: control target
= control target key end

     0   :  { %vm71_vm0 = vcmask 261120   ;;  %v441_v6 = vmov 0   ;;  %s646_s0 = inlined_call_operand.vmem [shape: f32[16,32], index: 0, kind: input, shape index: {}]   ;;  %s647_s1 = inlined_call_operand.vmem [shape: f32[32,32], index: 1, kind: input, shape index: {}]   ;;  %s648_s2 = inlined_call_operand.vmem [shape: f32[32,1], index: 2, kind: input, shape index: {}]   ;;  %s649_s3 = inlined_call_operand.vmem [shape: f32[32,1], index: 3, kind: input, shape index: {}]   ;;  %s650_s4 = inlined_call_operand.<no memory space> [shape: f32[1,1], index: 4, kind: input, shape index: {}]   ;;  %s651_s5 = inlined_call_operand.hbm [shape: f32[1,1,128], index: 5, kind: output, shape index: {}]  }
   0x1   :  { %v35_v0 = vld [vmem:[%s646_s0] sm:$0xff]  ;;  %v36_v1 = vld [vmem:[%s646_s0 + $0x8] sm:$0xff]  ;;  %v37_v2 = vld [vmem:[%s646_s0 + $0x10] sm:$0xff]  ;;  %415 = vset.pattern.permute.xlu0 %v441_v6  ;;  %416 = vset.pattern.permute.xlu1 %v441_v6 }
   0x2   :  { %v349_v3 = vpack.c.bf16 %v36_v1, %v35_v0  ;;  %vm484_vm1 = vmpackc.low %vm71_vm0, %vm71_vm0  ;;  %v38_v5 = vld [vmem:[%s646_s0 + $0x18] sm:$0xff]  ;;  %v22_v8 = vld [vmem:[%s647_s1] sm:$0xff] }
   0x3   :  { %v355_v7 = vpack.c.bf16 %v38_v5, %v37_v2  ;;  %v39_v9 = vld [vmem:[%s646_s0 + $0x20] sm:$0xff]  ;;  %v40_v10 = vld [vmem:[%s646_s0 + $0x28] sm:$0xff]  ;;  %343 = vmatprep.mubr.msk.f32.mxu0 %vm71_vm0, %v22_v8  ;;  %v24_v11 = vld [vmem:[%s647_s1 + $0x10] sm:$0xff] }
   0x4   :  { %351 = vmatprep.subr.msk.bf16.mxu0 %vm484_vm1, %v349_v3  ;;  %397 = vmatprep.subr.msk.bf16.mxu1 %vm484_vm1, %v349_v3  ;;  %v26_v12 = vld [vmem:[%s648_s2] sm:$0xff]  ;;  %v28_v13 = vld [vmem:[%s648_s2 + $0x10] sm:$0xff]  ;;  %v361_v14 = vpack.c.bf16 %v40_v10, %v39_v9 }
   0x5   :  { %354 = vmatpush3.bf16.xpose.msk.msra.mxu0 %vm484_vm1, %v349_v3  ;;  %405 = vmatpush3.bf16.xpose.msk.msra.mxu1 %vm484_vm1, %v349_v3 }
   0x6   :  { %357 = vmatprep.subr.msk.bf16.mxu0 %vm484_vm1, %v355_v7  ;;  %398 = vmatprep.subr.msk.bf16.mxu1 %vm484_vm1, %v355_v7 }
   0x7   :  { %346 = vmatprep.mubr.msk.f32.mxu1 %vm71_vm0, %v24_v11  ;;  %53 = vperm.xlu0 %415, %v26_v12  }
   0x8   :  { %63 = vperm.xlu1 %416, %v28_v13  }
   0x9   :  { %11 = vsyncpa [#allocation4], 0  ;;  %v27_v15 = vld [vmem:[%s648_s2 + $0x8] sm:$0xff]  ;;  %v29_v16 = vld [vmem:[%s648_s2 + $0x18] sm:$0xff]  ;;  %v254_v6 = vstv %s650_s4  ;;  %s442_s21 = smov [#allocation3]  }
   0xa   :  { %v41_v17 = vld [vmem:[%s646_s0 + $0x30] sm:$0xff]  ;;  %v42_v18 = vld [vmem:[%s646_s0 + $0x38] sm:$0xff]  ;;  %v30_v19 = vld [vmem:[%s649_s3] sm:$0xff]  ;;  %s263_s22 = sshll.u32 %s442_s21, 4  ;;  %s264_s22 = int_to_ptr.vmem [resolvable:$true] %s263_s22 }
   0xb   :  { %58 = vperm.xlu0 %415, %v27_v15   ;;  %v31_v20 = vld [vmem:[%s649_s3 + $0x8] sm:$0xff]  ;;  %v367_v21 = vpack.c.bf16 %v42_v18, %v41_v17  ;;  %v32_v22 = vld [vmem:[%s649_s3 + $0x10] sm:$0xff]  ;;  %v33_v23 = vld [vmem:[%s649_s3 + $0x18] sm:$0xff]  ;;  %s417_s23 = scalar_lea.vmem %s264_s22, 16  ;;  %s421_s24 = scalar_lea.vmem %s264_s22, 32 }
   0xc   :  { %68 = vperm.xlu1 %416, %v29_v16   ;;  %v43_v24 = vld [vmem:[%s646_s0 + $0x40] sm:$0xff]  ;;  %v44_v25 = vld [vmem:[%s646_s0 + $0x48] sm:$0xff]  ;;  %v45_v27 = vld [vmem:[%s646_s0 + $0x50] sm:$0xff]  ;;  %p418_p0 = scmp.ne.s32.totalorder %s264_s22, %s417_s23  ;;  %p422_p1 = scmp.lt.s32.totalorder %s264_s22, %s264_s22 }
   0xd   :  { %360 = vmatpush3.bf16.xpose.msk.msra.mxu0 %vm484_vm1, %v355_v7  ;;  %406 = vmatpush3.bf16.xpose.msk.msra.mxu1 %vm484_vm1, %v355_v7  ;;  %v373_v26 = vpack.c.bf16 %v44_v25, %v43_v24  ;;  %v46_v28 = vld [vmem:[%s646_s0 + $0x58] sm:$0xff]  ;;  %v47_v30 = vld [vmem:[%s646_s0 + $0x60] sm:$0xff]  ;;  %v48_v31 = vld [vmem:[%s646_s0 + $0x68] sm:$0xff]  ;;  %p423_p2 = scmp.lt.s32.totalorder %s421_s24, %s417_s23 }
   0xe   :  { %363 = vmatprep.subr.msk.bf16.mxu0 %vm484_vm1, %v361_v14  ;;  %399 = vmatprep.subr.msk.bf16.mxu1 %vm484_vm1, %v361_v14  ;;  %v379_v29 = vpack.c.bf16 %v46_v28, %v45_v27  ;;  %v385_v32 = vpack.c.bf16 %v48_v31, %v47_v30  ;;  %v49_v33 = vld [vmem:[%s646_s0 + $0x70] sm:$0xff]  ;;  %v50_v34 = vld [vmem:[%s646_s0 + $0x78] sm:$0xff]  ;;  %v23_v36 = vld [vmem:[%s647_s1 + $0x8] sm:$0xff] }
   0xf   :  { %223 = vperm.xlu0 %415, %v30_v19   ;;  %v391_v35 = vpack.c.bf16 %v50_v34, %v49_v33  ;;  %v25_v37 = vld [vmem:[%s647_s1 + $0x18] sm:$0xff]  ;;  %p424_p3 = por %p423_p2, %p422_p1 }
  0x10   :  { %228 = vperm.xlu1 %416, %v31_v20  }
  0x11   :  { %p425_p4 = pnand %p424_p3, %p418_p0 }
  0x13   :  { %233 = vperm.xlu0 %415, %v32_v22  }
  0x14   :  { %238 = vperm.xlu1 %416, %v33_v23  }
  0x15   :  { %366 = vmatpush3.bf16.xpose.msk.msra.mxu0 %vm484_vm1, %v361_v14  ;;  %407 = vmatpush3.bf16.xpose.msk.msra.mxu1 %vm484_vm1, %v361_v14 }
  0x16   :  { %369 = vmatprep.subr.msk.bf16.mxu0 %vm484_vm1, %v367_v21  ;;  %400 = vmatprep.subr.msk.bf16.mxu1 %vm484_vm1, %v367_v21 }
  0x1d   :  { %372 = vmatpush3.bf16.xpose.msk.msra.mxu0 %vm484_vm1, %v367_v21  ;;  %408 = vmatpush3.bf16.xpose.msk.msra.mxu1 %vm484_vm1, %v367_v21 }
  0x1e   :  { %375 = vmatprep.subr.msk.bf16.mxu0 %vm484_vm1, %v373_v26  ;;  %401 = vmatprep.subr.msk.bf16.mxu1 %vm484_vm1, %v373_v26 }
  0x25   :  { %378 = vmatpush3.bf16.xpose.msk.msra.mxu0 %vm484_vm1, %v373_v26  ;;  %409 = vmatpush3.bf16.xpose.msk.msra.mxu1 %vm484_vm1, %v373_v26 }
  0x26   :  { %381 = vmatprep.subr.msk.bf16.mxu0 %vm484_vm1, %v379_v29  ;;  %402 = vmatprep.subr.msk.bf16.mxu1 %vm484_vm1, %v379_v29 }
  0x2d   :  { %384 = vmatpush3.bf16.xpose.msk.msra.mxu0 %vm484_vm1, %v379_v29  ;;  %410 = vmatpush3.bf16.xpose.msk.msra.mxu1 %vm484_vm1, %v379_v29 }
  0x2e   :  { %387 = vmatprep.subr.msk.bf16.mxu0 %vm484_vm1, %v385_v32  ;;  %403 = vmatprep.subr.msk.bf16.mxu1 %vm484_vm1, %v385_v32 }
  0x35   :  { %390 = vmatpush3.bf16.xpose.msk.msra.mxu0 %vm484_vm1, %v385_v32  ;;  %411 = vmatpush3.bf16.xpose.msk.msra.mxu1 %vm484_vm1, %v385_v32 }
  0x36   :  { %393 = vmatprep.subr.msk.bf16.mxu0 %vm484_vm1, %v391_v35  ;;  %404 = vmatprep.subr.msk.bf16.mxu1 %vm484_vm1, %v391_v35 }
  0x3d   :  { %396 = vmatpush3.bf16.xpose.msk.msra.mxu0 %vm484_vm1, %v391_v35  ;;  %412 = vmatpush3.bf16.xpose.msk.msra.mxu1 %vm484_vm1, %v391_v35 }
  0x44   :  { %344 = vmatmul.mubr.msk.f32.vlgmr.msra.gmra.mrb[0].mxu0 %vm71_vm0, %v23_v36  ;;  %347 = vmatmul.mubr.msk.f32.vlgmr.msra.gmra.mrb[0].mxu1 %vm71_vm0, %v25_v37 }
  0x86   :  { %v54_v38 = vpop.permute.xlu0 %53 }
  0x87   :  { %v64_v39 = vpop.permute.xlu1 %63 }
  0x8a   :  { %v59_v40 = vpop.permute.xlu0 %58 }
  0x8b   :  { %v69_v41 = vpop.permute.xlu1 %68 }
  0x8e   :  { %v224_v42 = vpop.permute.xlu0 %223 }
  0x8f   :  { %v229_v51 = vpop.permute.xlu1 %228 }
  0x92   :  { %v234_v58 = vpop.permute.xlu0 %233 }
  0x93   :  { %v239_v61 = vpop.permute.xlu1 %238 }
 0x117   :  { %v345_v43 = vpop.f32.mrb[0].mxu0  ;;  %v348_v44 = vpop.f32.mrb[0].mxu1 }
 0x118   :  { %v204_v45 = vadd.f32 %v345_v43, %v59_v40  ;;  %v198_v46 = vpop.f32.mrb[1].mxu0  ;;  %v208_v47 = vpop.f32.mrb[1].mxu1  ;;  %v214_v48 = vadd.f32 %v348_v44, %v69_v41 }
 0x119   :  { %v199_v49 = vadd.f32 %v198_v46, %v54_v38  ;;  %v209_v50 = vadd.f32 %v208_v47, %v64_v39 }
 0x11a   :  { %v218_v52 = vmax.f32 %v204_v45, 0.0  ;;  %v220_v56 = vmax.f32 %v214_v48, 0.0 }
 0x11b   :  { %v217_v53 = vmax.f32 %v199_v49, 0.0  ;;  %v219_v54 = vmax.f32 %v209_v50, 0.0 }
 0x11c   :  { %v242_v55 = vmul.f32 %v229_v51, %v218_v52  ;;  %v244_v62 = vmul.f32 %v239_v61, %v220_v56 }
 0x11d   :  { %v241_v57 = vmul.f32 %v224_v42, %v217_v53  ;;  %v243_v60 = vmul.f32 %v234_v58, %v219_v54 }
 0x11f   :  { %v245_v59 = vadd.f32 %v242_v55, %v241_v57 }
 0x121   :  { %v246_v63 = vadd.f32 %v245_v59, %v243_v60 }
 0x123   :  { %v247_v0 = vadd.f32 %v246_v63, %v244_v62 }
 0x125   :  { %v248_v1 = vrot.slane %v247_v0, 4 }
 0x127   :  { %v249_v2 = vadd.f32 %v248_v1, %v247_v0 }
 0x129   :  { %v250_v3 = vrot.slane %v249_v2, 2 }
 0x12b   :  { %v251_v4 = vadd.f32 %v250_v3, %v249_v2 }
 0x12d   :  { %v252_v5 = vrot.slane %v251_v4, 1 }
 0x12f   :  { %v253_v7 = vadd.f32 %v252_v5, %v251_v4 }
 0x131   :  { %v255_v8 = vadd.f32 %v254_v6, %v253_v7 }
 0x133   :  { %256 = vst [vmem:[#allocation3] sm:$0x1] %v255_v8 }
 0x134   :  { %428 = shalt.err (!%p425_p4)
}
 0x135   :  { %s429_s27 = scalar_lea.hbm %s651_s5, 16 }
 0x136   :  { %p430_p5 = scmp.ne.s32.totalorder %s651_s5, %s429_s27  ;;  %p433_p6 = scmp.lt.u32.totalorder %s429_s27, %s651_s5 }
 0x138   :  { %p435_p7 = pnand %p433_p6, %p430_p5 }
 0x13a   :  { %438 = shalt.err (!%p435_p7)
}
 0x13b   :  { %266 = dma.vmem_to_hbm [thread:$0]  %s264_s22, 16, %s651_s5, [#allocation4]  }
 0x13c   :  { %439 = dma.done.wait [#allocation4], 16  }
 0x13d   :  { %440 = vsyncadd [#allocation4], 4294967280 }
 0x13e   :  { %270 = vsyncpa [#allocation4], 1 }

</bundles_post_ra>
